<compile_context>
chip_gen: v7x
topology: tpu7x:2x2x1
jax: 0.10.0
libtpu: 0.0.40
codegen_flags: <defaults>
</compile_context>

<pallas_src>
import math
import numpy as np
import jax
import jax.numpy as jnp
from jax.experimental import pallas as pl
from jax.experimental.pallas import tpu as pltpu

RADIUS = 12          # int(4 * 3 + 0.5)
SIGMA = 3.0
THRE1 = 0.1
BOXSIZE = 368
STRIDE = 8


def _round_up(x, m):
    return ((x + m - 1) // m) * m


def _gauss_taps():
    x = np.arange(-RADIUS, RADIUS + 1, dtype=np.float64)
    phi = np.exp(-0.5 / (SIGMA * SIGMA) * x * x)
    return phi / phi.sum()


GAUSS_TAPS = _gauss_taps()


def _blur_matrix(L):
    """(L, L) matrix M s.t. (x @ M) == F.conv1d(pad_symmetric(x, R, R), gauss)."""
    idx = np.concatenate([np.arange(RADIUS - 1, -1, -1),
                          np.arange(L),
                          L - 1 - np.arange(RADIUS)]).astype(np.int64)
    M = np.zeros((L, L), dtype=np.float64)
    for i in range(L):                       # output position
        for t in range(2 * RADIUS + 1):
            M[idx[i + t], i] += GAUSS_TAPS[t]
    return M


def _blur_peak_matrices(H, W):
    """bf16 Toeplitz blur matrices emitting an aligned, zero-padded map.

    tw: (W, Wp)  — X @ tw blurs along width; columns >= W are exactly zero.
    ah: (Hp, H)  — ah @ Y blurs along height; rows >= H are exactly zero.
    Wp = round_up(W+1, 128), Hp = round_up(H+1, 8): lane-dense output AND at
    least one zero pad row/col, so pltpu.roll's wrap-around reads an exact 0.0
    (the edge value of peak(..., 0.0)) at every real border pixel.
    """
    Hp = _round_up(H + 1, 8)
    Wp = _round_up(W + 1, 128)
    tw = np.zeros((W, Wp), dtype=np.float64)
    tw[:, :W] = _blur_matrix(W)
    ah = np.zeros((Hp, H), dtype=np.float64)
    ah[:H, :] = _blur_matrix(H).T
    return jnp.asarray(tw, jnp.bfloat16), jnp.asarray(ah, jnp.bfloat16)


# ---------------------------- Pallas kernels ----------------------------

def _blur_peak_kernel(x_ref, tw_ref, ah_ref, m_ref):
    # x_ref : (Cb, H, W)  bf16 raw heatmap channels
    # tw_ref: (W, Wp) bf16, ah_ref: (Hp, H) bf16 — resident Toeplitz blur matrices
    # m_ref : (Cb, Hp, Wp) int8 peak mask of the gaussian-enhanced channels
    Cb = x_ref.shape[0]
    Hp = m_ref.shape[1]
    Wp = m_ref.shape[2]
    tw = tw_ref[...]
    ah = ah_ref[...]
    for c in range(Cb):                       # static unroll (Cb is small)
        # bf16 MXU matmuls, f32 accumulation.
        xb = jnp.dot(x_ref[c], tw, preferred_element_type=jnp.float32)      # (H, Wp)
        p = jnp.dot(ah, xb.astype(jnp.bfloat16),
                    preferred_element_type=jnp.float32)                     # (Hp, Wp)
        # p has >= 1 exact-zero pad row/col, so the roll wrap reproduces the
        # peak(..., edge=0.0) boundary regardless of the roll direction.
        h_a = pltpu.roll(p, 1, 1)
        h_b = pltpu.roll(p, Wp - 1, 1)
        v_a = pltpu.roll(p, 1, 0)
        v_b = pltpu.roll(p, Hp - 1, 0)
        m = (p >= h_a) & (p >= h_b) & (p >= v_a) & (p >= v_b) & (p > THRE1)
        m_ref[c] = m.astype(jnp.int8)


def _head_kernel(a_ref, w_ref, b_ref, o_ref):
    # a_ref: (3, TP) bf16 pixels channel-major, w_ref: (COp, 3) f32, b_ref: (COp, 1)
    # o_ref: (COp, TP) f32.  K=3 1x1 conv as 3 VPU broadcast FMAs (f32 accumulate).
    a = a_ref[...].astype(jnp.float32)
    w = w_ref[...]
    o_ref[...] = (w[:, 0:1] * a[0:1, :]
                  + w[:, 1:2] * a[1:2, :]
                  + w[:, 2:3] * a[2:3, :]
                  + b_ref[...])


# ---------------------------- wrappers ----------------------------

_CONST_SINGLE_BUFFER = None   # lazily resolved: does this JAX accept pl.Buffered(1)?


def _blur_peak_call(C, Cb, H, W, Hp, Wp, vmem_limit, single_buffer):
    if single_buffer:
        def const_spec(shape):
            return pl.BlockSpec(shape, lambda c: (0, 0),
                                pipeline_mode=pl.Buffered(1))
    else:
        def const_spec(shape):
            return pl.BlockSpec(shape, lambda c: (0, 0))
    return pl.pallas_call(
        _blur_peak_kernel,
        out_shape=jax.ShapeDtypeStruct((C, Hp, Wp), jnp.int8),
        grid=(C // Cb,),
        in_specs=[pl.BlockSpec((Cb, H, W), lambda c: (c, 0, 0)),
                  const_spec((W, Wp)),
                  const_spec((Hp, H))],
        out_specs=pl.BlockSpec((Cb, Hp, Wp), lambda c: (c, 0, 0)),
        compiler_params=pltpu.CompilerParams(
            dimension_semantics=("parallel",),
            vmem_limit_bytes=vmem_limit),
    )


def fused_blur_peak(hm, tw, ah):
    """hm: (C, H, W) f32 raw heatmap -> (C, H, W) int8 peak mask of blurred map."""
    global _CONST_SINGLE_BUFFER
    C, H, W = hm.shape
    Wp = tw.shape[1]
    Hp = ah.shape[0]
    Cb = 3 if C % 3 == 0 else (2 if C % 2 == 0 else 1)   # 18 -> 6 even grid steps
    x = hm.astype(jnp.bfloat16)

    # VMEM working-set estimate (double-buffered x/mask, 2 const bufs worst case,
    # f32 intermediates), with headroom; floor 32 MiB, cap at v7x physical 64 MiB.
    ws = (2 * Cb * H * W * 2 + 2 * Cb * Hp * Wp
          + 2 * (W * Wp + Hp * H) * 2
          + 6 * Hp * Wp * 4 + H * Wp * 4)
    vmem_limit = int(min(max(2 * ws + (8 << 20), 32 << 20), 64 << 20))

    if _CONST_SINGLE_BUFFER is None:
        try:
            out = _blur_peak_call(C, Cb, H, W, Hp, Wp, vmem_limit, True)(x, tw, ah)
            jax.block_until_ready(out)
            _CONST_SINGLE_BUFFER = True
        except Exception:
            # pipeline_mode=pl.Buffered(1) not supported by this JAX build; the
            # constant Toeplitz inputs fall back to default double-buffering.
            _CONST_SINGLE_BUFFER = False
            out = _blur_peak_call(C, Cb, H, W, Hp, Wp, vmem_limit, False)(x, tw, ah)
    else:
        out = _blur_peak_call(C, Cb, H, W, Hp, Wp, vmem_limit,
                              _CONST_SINGLE_BUFFER)(x, tw, ah)
    return out[:, :H, :W]


def head_apply(a, w_t_pad, b_pad, n_out):
    """a: (3, NP) channel-major pixels -> (n_out, NP) head output (VPU FMAs)."""
    cin, NP = a.shape
    cop = w_t_pad.shape[0]
    NPp = _round_up(NP, 128)
    # Single grid step when the pixel slab is small (it is for any realistic image);
    # otherwise fall back to large lane tiles to keep stores unmasked.
    TP = NPp if NPp <= (1 << 15) else 4096
    NPp = _round_up(NPp, TP)
    a_p = jnp.pad(a, ((0, 0), (0, NPp - NP))).astype(jnp.bfloat16)
    out = pl.pallas_call(
        _head_kernel,
        out_shape=jax.ShapeDtypeStruct((cop, NPp), jnp.float32),
        grid=(NPp // TP,),
        in_specs=[pl.BlockSpec((cin, TP), lambda p: (0, p)),
                  pl.BlockSpec((cop, cin), lambda p: (0, 0)),
                  pl.BlockSpec((cop, 1), lambda p: (0, 0))],
        out_specs=pl.BlockSpec((cop, TP), lambda p: (0, p)),
        compiler_params=pltpu.CompilerParams(dimension_semantics=("parallel",)),
    )(a_p, w_t_pad, b_pad)
    return out[:n_out, :NP]


# ---------------------------- predictor ----------------------------

class OpenPosePredictorPallas:
    def __init__(self, key):
        # TODO(synk): real bodypose_model + param_path checkpoint are external/undefined;
        # replaced by a deterministic stride-8 1x1-conv stand-in (38 PAF + 19 heatmap ch).
        k1, k2 = jax.random.split(key)
        head_w = jax.random.normal(k1, (3, 57), dtype=jnp.float32) * 0.5
        head_b = jax.random.normal(k2, (57,), dtype=jnp.float32) * 0.1
        self.n_out = 57
        cop = 64                                           # pad 57 -> 64 sublanes, once
        self.head_w_t = jnp.pad(head_w.T, ((0, cop - 57), (0, 0)))        # (64, 3)
        self.head_b = jnp.pad(head_b[:, None], ((0, cop - 57), (0, 0)))   # (64, 1)
        self.boxsize = BOXSIZE
        self.stride = STRIDE
        self.thre1 = THRE1
        self._blur_cache = {}

    def _blur_mats(self, H, W):
        if (H, W) not in self._blur_cache:
            self._blur_cache[(H, W)] = _blur_peak_matrices(H, W)
        return self._blur_cache[(H, W)]

    def _model(self, x):
        # x: (1, 3, Hp, Wp) -> L1 (1, 38, Hp/8, Wp/8), L2 (1, 19, Hp/8, Wp/8)
        feat = x[:, :, ::self.stride, ::self.stride]
        _, c, h8, w8 = feat.shape
        a = feat[0].reshape(c, h8 * w8)                    # channel-major, no transpose
        out = head_apply(a, self.head_w_t, self.head_b, self.n_out)   # (57, h8*w8)
        out = out.reshape(self.n_out, h8, w8)[None]
        L1 = out[:, 19:57]   # 38-channel PAF head
        L2 = out[:, 0:19]    # 19-channel heatmap head
        return L1, L2

    def forward(self, img):
        assert img.ndim == 4 and img.shape[0] == 1 and img.dtype == jnp.float32
        batch, c, height, width = img.shape
        scale = float(0.5 * self.boxsize / height)
        new_h = int(math.floor(height * scale))
        new_w = int(math.floor(width * scale))
        # TODO(synk): torch bicubic interpolate approximated with jax.image.resize(method='cubic').
        image_to_test = jax.image.resize(img, (batch, c, new_h, new_w), method='cubic')
        padding_bottom = 0 if height % self.stride == 0 else self.stride - height % self.stride
        padding_right = 0 if width % self.stride == 0 else self.stride - width % self.stride
        image_padded = jnp.pad(image_to_test,
                               ((0, 0), (0, 0), (0, padding_bottom), (0, padding_right)))
        L1, L2 = self._model(image_padded)
        ph, pw = image_padded.shape[2], image_padded.shape[3]

        def upsample(y, n_ch):
            # Two-stage resize kept to preserve the reference module's semantics.
            y = jax.image.resize(
                y, (1, n_ch, y.shape[2] * self.stride, y.shape[3] * self.stride),
                method='cubic')
            y = y[:, :, :ph - padding_bottom, :pw - padding_right]
            y = jax.image.resize(y, (1, n_ch, height, width), method='cubic')
            return y

        heatmap = upsample(L2, 19)[:, :-1]                    # (1, 18, H, W)
        paf = upsample(L1, 38)                                # (1, 38, H, W)

        # Fused Pallas kernel: separable gaussian blur (bf16 Toeplitz MXU matmuls
        # with symmetric boundary baked in) + roll-based 4-neighbour peak/threshold,
        # lane-dense int8 mask output.
        tw, ah = self._blur_mats(height, width)
        mask = fused_blur_peak(heatmap[0], tw, ah)            # (18, H, W) int8

        # Host-side dynamic-shape postprocessing (nonzero / boolean gather has no
        # static-shape Pallas equivalent).  NOTE: peak values are read from the
        # UN-blurred heatmap (map_ori) while the mask comes from the blurred map,
        # matching the reference.
        mask_np = np.asarray(mask).astype(bool)
        hm_np = np.asarray(heatmap[0])
        cs, ys, xs = np.nonzero(mask_np)
        vals = hm_np[mask_np]
        ids = np.arange(cs.shape[0])
        peak_with_data = np.stack([cs.astype(np.float32),
                                   ys.astype(np.float32),
                                   xs.astype(np.float32),
                                   vals.astype(np.float32),
                                   ids.astype(np.float32)], axis=1)
        all_peaks = [peak_with_data[peak_with_data[:, 0] == ch][:, [2, 1, 3, 4]]
                     for ch in range(18)]
        return all_peaks, jnp.transpose(paf[0], (1, 2, 0)), height


if __name__ == "__main__":
    key = jax.random.PRNGKey(0)
    k_img, k_model = jax.random.split(key)
    img = jax.random.uniform(k_img, (1, 3, 16, 16), dtype=jnp.float32)

    predictor = OpenPosePredictorPallas(k_model)
    all_peaks, paf_hwc, height = predictor.forward(img)
    jax.block_until_ready(paf_hwc)

    assert paf_hwc.shape == (16, 16, 38)
    assert len(all_peaks) == 18
    print("KERNEL_OK")
</pallas_src>

<mosaic_0001>
module attributes {stable_mosaic.version = 11 : i64} {
  func.func @_head_kernel(%arg0: i32, %arg1: memref<3x640xbf16, #tpu.memory_space<vmem>>, %arg2: memref<64x3xf32, #tpu.memory_space<vmem>>, %arg3: memref<64x1xf32, #tpu.memory_space<vmem>>, %arg4: memref<64x640xf32, #tpu.memory_space<vmem>>) attributes {dimension_semantics = [#tpu.dimension_semantics<parallel>], iteration_bounds = array<i64: 1>, scalar_prefetch = 0 : i64, scratch_operands = 0 : i64, tpu.core_type = #tpu.core_type<tc>, window_params = [{transform_indices = @transform_0, window_bounds = array<i64: 3, 640>}, {pipeline_mode = #tpu.pipeline_mode<synchronous>, transform_indices = @transform_1, window_bounds = array<i64: 64, 3>}, {pipeline_mode = #tpu.pipeline_mode<synchronous>, transform_indices = @transform_2, window_bounds = array<i64: 64, 1>}, {transform_indices = @transform_3, window_bounds = array<i64: 64, 640>}]} {
    %c0 = arith.constant 0 : index
    %c0_0 = arith.constant 0 : index
    %0 = vector.load %arg1[%c0, %c0_0] : memref<3x640xbf16, #tpu.memory_space<vmem>>, vector<3x640xbf16>
    %1 = arith.extf %0 : vector<3x640xbf16> to vector<3x640xf32>
    %c0_1 = arith.constant 0 : index
    %c0_2 = arith.constant 0 : index
    %2 = vector.load %arg2[%c0_1, %c0_2] : memref<64x3xf32, #tpu.memory_space<vmem>>, vector<64x3xf32>
    %3 = vector.extract_strided_slice %2 {offsets = [0, 0], sizes = [64, 1], strides = [1, 1]} : vector<64x3xf32> to vector<64x1xf32>
    %4 = vector.extract_strided_slice %1 {offsets = [0, 0], sizes = [1, 640], strides = [1, 1]} : vector<3x640xf32> to vector<1x640xf32>
    %5 = vector.broadcast %3 : vector<64x1xf32> to vector<64x640xf32>
    %6 = vector.broadcast %4 : vector<1x640xf32> to vector<64x640xf32>
    %7 = arith.mulf %5, %6 : vector<64x640xf32>
    %8 = vector.extract_strided_slice %2 {offsets = [0, 1], sizes = [64, 1], strides = [1, 1]} : vector<64x3xf32> to vector<64x1xf32>
    %9 = vector.extract_strided_slice %1 {offsets = [1, 0], sizes = [1, 640], strides = [1, 1]} : vector<3x640xf32> to vector<1x640xf32>
    %10 = vector.broadcast %8 : vector<64x1xf32> to vector<64x640xf32>
    %11 = vector.broadcast %9 : vector<1x640xf32> to vector<64x640xf32>
    %12 = arith.mulf %10, %11 : vector<64x640xf32>
    %13 = arith.addf %7, %12 : vector<64x640xf32>
    %14 = vector.extract_strided_slice %2 {offsets = [0, 2], sizes = [64, 1], strides = [1, 1]} : vector<64x3xf32> to vector<64x1xf32>
    %15 = vector.extract_strided_slice %1 {offsets = [2, 0], sizes = [1, 640], strides = [1, 1]} : vector<3x640xf32> to vector<1x640xf32>
    %16 = vector.broadcast %14 : vector<64x1xf32> to vector<64x640xf32>
    %17 = vector.broadcast %15 : vector<1x640xf32> to vector<64x640xf32>
    %18 = arith.mulf %16, %17 : vector<64x640xf32>
    %19 = arith.addf %13, %18 : vector<64x640xf32>
    %c0_3 = arith.constant 0 : index
    %c0_4 = arith.constant 0 : index
    %20 = vector.load %arg3[%c0_3, %c0_4] : memref<64x1xf32, #tpu.memory_space<vmem>>, vector<64x1xf32>
    %21 = vector.broadcast %20 : vector<64x1xf32> to vector<64x640xf32>
    %22 = arith.addf %19, %21 : vector<64x640xf32>
    %c0_5 = arith.constant 0 : index
    %c0_6 = arith.constant 0 : index
    %23 = vector.load %arg4[%c0_5, %c0_6] : memref<64x640xf32, #tpu.memory_space<vmem>>, vector<64x640xf32>
    tpu.vector_store %arg4[%c0_5, %c0_6], %22 {strides = array<i32>} : memref<64x640xf32, #tpu.memory_space<vmem>>, vector<64x640xf32>,
    return
  }
  func.func @transform_0(%arg0: i32) -> (i32, i32) {
    %c0_i32 = arith.constant 0 : i32
    %c0_i32_0 = arith.constant 0 : i32
    return %c0_i32, %arg0 : i32, i32
  }
  func.func @transform_1(%arg0: i32) -> (i32, i32) {
    %c0_i32 = arith.constant 0 : i32
    %c0_i32_0 = arith.constant 0 : i32
    %c0_i32_1 = arith.constant 0 : i32
    return %c0_i32, %c0_i32_0 : i32, i32
  }
  func.func @transform_2(%arg0: i32) -> (i32, i32) {
    %c0_i32 = arith.constant 0 : i32
    %c0_i32_0 = arith.constant 0 : i32
    %c0_i32_1 = arith.constant 0 : i32
    return %c0_i32, %c0_i32_0 : i32, i32
  }
  func.func @transform_3(%arg0: i32) -> (i32, i32) {
    %c0_i32 = arith.constant 0 : i32
    %c0_i32_0 = arith.constant 0 : i32
    return %c0_i32, %arg0 : i32, i32
  }
}

</mosaic_0001>

<bundles_post_ra>
// kernel: tpu_custom_call.1
= control target key start
LH: loop header
LB: loop body
LE: loop exit
PB: predicated region body
PF: predicated region fallthrough
CT: control target
= control target key end

     0   :  { %v651_v2 = vmov 1   ;;  %v652_v3 = vmov 0   ;;  %s1131_s0 = inlined_call_operand.vmem [shape: bf16[3,640], index: 0, kind: input, shape index: {}]   ;;  %s1132_s1 = inlined_call_operand.vmem [shape: f32[64,3], index: 1, kind: input, shape index: {}]   ;;  %s1133_s2 = inlined_call_operand.vmem [shape: f32[64,1], index: 2, kind: input, shape index: {}]   ;;  %s1134_s3 = inlined_call_operand.hbm [shape: f32[64,640], index: 3, kind: output, shape index: {}]  }
   0x1   :  { %v22_v0 = vld [vmem:[%s1132_s1 + $0x10] sm:$0xff]  ;;  %v20_v1 = vld [vmem:[%s1132_s1] sm:$0xff]  ;;  %621 = vset.pattern.permute.xlu0 %v651_v2  ;;  %620 = vset.pattern.permute.xlu1 %v652_v3  ;;  %v23_v4 = vld [vmem:[%s1132_s1 + $0x18] sm:$0xff] }
   0x2   :  { %40 = vperm.xlu1 %620, %v22_v0   ;;  %157 = vperm.xlu0 %621, %v20_v1  }
   0x6   :  { %45 = vperm.xlu1 %620, %v23_v4   ;;  %169 = vperm.xlu0 %621, %v23_v4  }
   0x7   :  { %8 = vsyncpa [#allocation3], 0  ;;  %v25_v5 = vld [vmem:[%s1132_s1 + $0x28] sm:$0xff]  ;;  %v27_v6 = vld [vmem:[%s1132_s1 + $0x38] sm:$0xff]  ;;  %v653_v8 = vmov 2   ;;  %v71_v19 = vlaneseq }
   0x8   :  { %v21_v7 = vld [vmem:[%s1132_s1 + $0x8] sm:$0xff]  ;;  %v24_v9 = vld [vmem:[%s1132_s1 + $0x20] sm:$0xff]  ;;  %v26_v10 = vld [vmem:[%s1132_s1 + $0x30] sm:$0xff] }
   0x9   :  { %v470_v11 = vld [vmem:[%s1133_s2] sm:$0xff]  ;;  %v473_v12 = vld [vmem:[%s1133_s2 + $0x18] sm:$0xff]  ;;  %v475_v13 = vld [vmem:[%s1133_s2 + $0x28] sm:$0xff]  ;;  %v72_v20 = vshrl.u32 %v71_v19, 7 }
   0xa   :  { %55 = vperm.xlu1 %620, %v25_v5   ;;  %177 = vperm.xlu0 %621, %v25_v5   ;;  %v471_v14 = vld [vmem:[%s1133_s2 + $0x8] sm:$0xff]  ;;  %v477_v15 = vld [vmem:[%s1133_s2 + $0x38] sm:$0xff]  ;;  %v472_v16 = vld [vmem:[%s1133_s2 + $0x10] sm:$0xff] }
   0xb   :  { %v474_v17 = vld [vmem:[%s1133_s2 + $0x20] sm:$0xff]  ;;  %v476_v18 = vld [vmem:[%s1133_s2 + $0x30] sm:$0xff]  ;;  %v16_v22 = vld [vmem:[%s1131_s0 + $0x8] sm:$0x3]  ;;  %v73_v23 = vsub.s32 0, %v72_v20  ;;  %v77_v24 = vsub.s32 4, %v72_v20 }
   0xc   :  { %v15_v21 = vld [vmem:[%s1131_s0] sm:$0xff]  ;;  %v19_v27 = vunpack.c.l.bf16 %v16_v22  ;;  %v190_v28 = vsub.s32 1, %v72_v20  ;;  %v194_v29 = vsub.s32 5, %v72_v20  ;;  %v347_v30 = vsub.s32 2, %v72_v20  ;;  %s654_s0 = smov [#allocation2]  }
   0xd   :  { %v17_v25 = vunpack.c.l.bf16 %v15_v21  ;;  %v18_v26 = vunpack.c.h.bf16 %v15_v21  ;;  %v351_v33 = vsub.s32 6, %v72_v20  ;;  %s603_s2 = sshll.u32 %s654_s0, 4  ;;  %s604_s2 = int_to_ptr.vmem [resolvable:$true] %s603_s2 }
   0xe   :  { %65 = vperm.xlu1 %620, %v27_v6   ;;  %185 = vperm.xlu0 %621, %v27_v6   ;;  %v90_v38 = vrot.slane %v19_v27, %v73_v23  ;;  %v207_v43 = vrot.slane %v19_v27, %v190_v28  ;;  %v364_v50 = vrot.slane %v19_v27, %v347_v30  ;;  %s627_s20 = scalar_lea.vmem %s604_s2, 5120  ;;  %p632_p1 = scmp.lt.s32.totalorder %s604_s2, %s604_s2 }
   0xf   :  { %v74_v34 = vrot.slane %v17_v25, %v73_v23  ;;  %v78_v35 = vrot.slane %v17_v25, %v77_v24  ;;  %v82_v36 = vrot.slane %v18_v26, %v73_v23  ;;  %v86_v37 = vrot.slane %v18_v26, %v77_v24  ;;  %p628_p0 = scmp.ne.s32.totalorder %s604_s2, %s627_s20  ;;  %p633_p2 = scmp.lt.s32.totalorder %s627_s20, %s627_s20 }
  0x10   :  { %v191_v39 = vrot.slane %v17_v25, %v190_v28  ;;  %v195_v40 = vrot.slane %v17_v25, %v194_v29  ;;  %v199_v41 = vrot.slane %v18_v26, %v190_v28  ;;  %v203_v42 = vrot.slane %v18_v26, %v194_v29 }
  0x11   :  { %v348_v44 = vrot.slane %v17_v25, %v347_v30  ;;  %v352_v47 = vrot.slane %v17_v25, %v351_v33  ;;  %v356_v48 = vrot.slane %v18_v26, %v347_v30  ;;  %v360_v49 = vrot.slane %v18_v26, %v351_v33  ;;  %p634_p3 = por %p633_p2, %p632_p1 }
  0x12   :  { %622 = vset.pattern.permute.xlu1 %v651_v2  ;;  %624 = vset.pattern.permute.xlu0 %v653_v8  ;;  %v731_v51 = vrot.slane %v74_v34, %v73_v23  ;;  %v733_v52 = vrot.slane %v78_v35, %v73_v23  ;;  %v735_v53 = vrot.slane %v82_v36, %v73_v23 }
  0x13   :  { %161 = vperm.xlu1 %622, %v21_v7   ;;  %318 = vperm.xlu0 %624, %v21_v7   ;;  %v737_v54 = vrot.slane %v86_v37, %v73_v23  ;;  %v739_v55 = vrot.slane %v90_v38, %v73_v23  ;;  %v741_v56 = vrot.slane %v191_v39, %v190_v28  ;;  %p635_p4 = pnand %p634_p3, %p628_p0 }
  0x14   :  { %v743_v57 = vrot.slane %v195_v40, %v190_v28  ;;  %v745_v58 = vrot.slane %v199_v41, %v190_v28  ;;  %v747_v59 = vrot.slane %v203_v42, %v190_v28  ;;  %v749_v60 = vrot.slane %v207_v43, %v190_v28 }
  0x15   :  { %v751_v61 = vrot.slane %v348_v44, %v347_v30  ;;  %v757_v2 = vrot.slane %v360_v49, %v347_v30 }
  0x17   :  { %165 = vperm.xlu1 %622, %v22_v0   ;;  %330 = vperm.xlu0 %624, %v24_v9  }
  0x1b   :  { %173 = vperm.xlu1 %622, %v24_v9   ;;  %338 = vperm.xlu0 %624, %v26_v10  }
  0x1f   :  { %181 = vperm.xlu1 %622, %v26_v10   ;;  %625 = vset.pattern.permute.xlu0 %v652_v3 }
  0x20   :  { %30 = vperm.xlu0 %625, %v20_v1  }
  0x23   :  { %623 = vset.pattern.permute.xlu1 %v653_v8 }
  0x24   :  { %314 = vperm.xlu1 %623, %v20_v1   ;;  %35 = vperm.xlu0 %625, %v21_v7   ;;  %v755_v1 = vrot.slane %v356_v48, %v347_v30 }
  0x28   :  { %322 = vperm.xlu1 %623, %v22_v0   ;;  %50 = vperm.xlu0 %625, %v24_v9   ;;  %v753_v0 = vrot.slane %v352_v47, %v347_v30 }
  0x2c   :  { %326 = vperm.xlu1 %623, %v23_v4   ;;  %60 = vperm.xlu0 %625, %v26_v10  }
  0x30   :  { %334 = vperm.xlu1 %623, %v25_v5   ;;  %480 = vperm.xlu0 %625, %v470_v11  }
  0x34   :  { %342 = vperm.xlu1 %623, %v27_v6   ;;  %495 = vperm.xlu0 %625, %v473_v12  }
  0x38   :  { %626 = vset.pattern.permute.xlu1 %v652_v3  ;;  %505 = vperm.xlu0 %625, %v475_v13   ;;  %v759_v3 = vrot.slane %v364_v50, %v347_v30 }
  0x39   :  { %485 = vperm.xlu1 %626, %v471_v14  }
  0x3c   :  { %515 = vperm.xlu0 %625, %v477_v15  }
  0x3d   :  { %490 = vperm.xlu1 %626, %v472_v16  }
  0x41   :  { %500 = vperm.xlu1 %626, %v474_v17  }
  0x45   :  { %510 = vperm.xlu1 %626, %v476_v18  }
  0x81   :  { %v41_v31 = vpop.permute.xlu1 %40  ;;  %v158_v32 = vpop.permute.xlu0 %157 }
  0x82   :  { %v762_v4 = vmul.f32 %v731_v51, %v41_v31  ;;  %v765_v5 = vmul.f32 %v733_v52, %v41_v31  ;;  %v768_v6 = vmul.f32 %v735_v53, %v41_v31  ;;  %v771_v7 = vmul.f32 %v737_v54, %v41_v31 }
  0x83   :  { %v778_v12 = vmul.f32 %v739_v55, %v41_v31  ;;  %v781_v13 = vmul.f32 %v741_v56, %v158_v32  ;;  %v784_v14 = vmul.f32 %v743_v57, %v158_v32  ;;  %v787_v15 = vmul.f32 %v745_v58, %v158_v32 }
  0x84   :  { %v790_v16 = vmul.f32 %v747_v59, %v158_v32  ;;  %v793_v17 = vmul.f32 %v749_v60, %v158_v32 }
  0x85   :  { %v46_v45 = vpop.permute.xlu1 %45  ;;  %v170_v46 = vpop.permute.xlu0 %169 }
  0x86   :  { %v131_v8 = vmul.f32 %v731_v51, %v46_v45  ;;  %v132_v9 = vmul.f32 %v733_v52, %v46_v45  ;;  %v248_v10 = vmul.f32 %v741_v56, %v170_v46  ;;  %v249_v11 = vmul.f32 %v743_v57, %v170_v46 }
  0x87   :  { %v133_v18 = vmul.f32 %v735_v53, %v46_v45  ;;  %v134_v19 = vmul.f32 %v737_v54, %v46_v45  ;;  %v135_v21 = vmul.f32 %v739_v55, %v46_v45  ;;  %v250_v22 = vmul.f32 %v745_v58, %v170_v46 }
  0x88   :  { %v251_v23 = vmul.f32 %v747_v59, %v170_v46  ;;  %v252_v24 = vmul.f32 %v749_v60, %v170_v46  ;;  %v801_v26 = vadd.f32 %v248_v10, %v131_v8  ;;  %v803_v27 = vadd.f32 %v249_v11, %v132_v9 }
  0x89   :  { %v56_v62 = vpop.permute.xlu1 %55  ;;  %v178_v63 = vpop.permute.xlu0 %177  ;;  %v819_v44 = vadd.f32 %v250_v22, %v133_v18 }
  0x8a   :  { %v141_v28 = vmul.f32 %v731_v51, %v56_v62  ;;  %v142_v29 = vmul.f32 %v733_v52, %v56_v62  ;;  %v143_v30 = vmul.f32 %v735_v53, %v56_v62  ;;  %v258_v31 = vmul.f32 %v741_v56, %v178_v63 }
  0x8b   :  { %v259_v32 = vmul.f32 %v743_v57, %v178_v63  ;;  %v260_v33 = vmul.f32 %v745_v58, %v178_v63  ;;  %v144_v34 = vmul.f32 %v737_v54, %v56_v62  ;;  %v145_v35 = vmul.f32 %v739_v55, %v56_v62 }
  0x8c   :  { %v261_v36 = vmul.f32 %v747_v59, %v178_v63  ;;  %v262_v37 = vmul.f32 %v749_v60, %v178_v63  ;;  %v821_v45 = vadd.f32 %v251_v23, %v134_v19  ;;  %v825_v48 = vadd.f32 %v252_v24, %v135_v21 }
  0x8d   :  { %v66_v20 = vpop.permute.xlu1 %65  ;;  %v186_v25 = vpop.permute.xlu0 %185  ;;  %v827_v49 = vadd.f32 %v258_v31, %v141_v28  ;;  %v829_v50 = vadd.f32 %v259_v32, %v142_v29  ;;  %v831_v62 = vadd.f32 %v260_v33, %v143_v30 }
  0x8e   :  { %v151_v38 = vmul.f32 %v731_v51, %v66_v20  ;;  %v152_v39 = vmul.f32 %v733_v52, %v66_v20  ;;  %v268_v40 = vmul.f32 %v741_v56, %v186_v25  ;;  %v269_v41 = vmul.f32 %v743_v57, %v186_v25 }
  0x8f   :  { %v153_v46 = vmul.f32 %v735_v53, %v66_v20  ;;  %v270_v47 = vmul.f32 %v745_v58, %v186_v25  ;;  %v833_v63 = vadd.f32 %v261_v36, %v144_v34  ;;  %v835_v8 = vadd.f32 %v262_v37, %v145_v35 }
  0x90   :  { %v154_v9 = vmul.f32 %v737_v54, %v66_v20  ;;  %v155_v10 = vmul.f32 %v739_v55, %v66_v20  ;;  %v271_v11 = vmul.f32 %v747_v59, %v186_v25  ;;  %v272_v18 = vmul.f32 %v749_v60, %v186_v25 }
  0x91   :  { %v841_v22 = vadd.f32 %v268_v40, %v151_v38  ;;  %v843_v23 = vadd.f32 %v269_v41, %v152_v39  ;;  %v854_v20 = vadd.f32 %v270_v47, %v153_v46 }
  0x92   :  { %v162_v42 = vpop.permute.xlu1 %161  ;;  %v319_v43 = vpop.permute.xlu0 %318 }
  0x93   :  { %1136 = vst [vmem:[#allocation5_spill] sm:$0xff] %v841_v22  ;;  %1137 = vst [vmem:[#allocation6_spill] sm:$0xff] %v843_v23  ;;  %v846_v24 = vmul.f32 %v741_v56, %v162_v42  ;;  %v849_v28 = vmul.f32 %v743_v57, %v162_v42  ;;  %v852_v29 = vmul.f32 %v745_v58, %v162_v42 }
  0x94   :  { %1138 = vst [vmem:[#allocation7_spill] sm:$0xff] %v854_v20  ;;  %v857_v30 = vmul.f32 %v747_v59, %v162_v42  ;;  %v863_v33 = vmul.f32 %v749_v60, %v162_v42  ;;  %v866_v34 = vmul.f32 %v751_v61, %v319_v43  ;;  %v871_v37 = vmul.f32 %v753_v0, %v319_v43 }
  0x95   :  { %v874_v38 = vmul.f32 %v755_v1, %v319_v43  ;;  %v877_v39 = vmul.f32 %v757_v2, %v319_v43  ;;  %v880_v40 = vmul.f32 %v759_v3, %v319_v43  ;;  %v892_v20 = vadd.f32 %v272_v18, %v155_v10 }
  0x96   :  { %v166_v19 = vpop.permute.xlu1 %165  ;;  %v331_v21 = vpop.permute.xlu0 %330 }
  0x97   :  { %v243_v25 = vmul.f32 %v741_v56, %v166_v19  ;;  %v244_v31 = vmul.f32 %v743_v57, %v166_v19  ;;  %v245_v32 = vmul.f32 %v745_v58, %v166_v19  ;;  %v246_v35 = vmul.f32 %v747_v59, %v166_v19  ;;  %1139 = vst [vmem:[#allocation8_spill] sm:$0xff] %v880_v40 }
  0x98   :  { %v247_v36 = vmul.f32 %v749_v60, %v166_v19  ;;  %v885_v46 = vmul.f32 %v751_v61, %v331_v21  ;;  %v888_v47 = vmul.f32 %v753_v0, %v331_v21  ;;  %v890_v19 = vadd.f32 %v271_v11, %v154_v9 }
  0x99   :  { %v895_v23 = vadd.f32 %v243_v25, %v762_v4  ;;  %v898_v22 = vadd.f32 %v244_v31, %v765_v5  ;;  %v901_v43 = vadd.f32 %v245_v32, %v768_v6  ;;  %v904_v40 = vmul.f32 %v755_v1, %v331_v21 }
  0x9a   :  { %v174_v41 = vpop.permute.xlu1 %173  ;;  %v882_v42 = vpop.permute.xlu0 %338  ;;  %1141 = vst [vmem:[#allocation10_spill] sm:$0xff] %v885_v46  ;;  %1142 = vst [vmem:[#allocation11_spill] sm:$0xff] %v888_v47  ;;  %v907_v46 = vadd.f32 %v246_v35, %v771_v7  ;;  %v910_v9 = vadd.f32 %v247_v36, %v778_v12  ;;  %v913_v10 = vmul.f32 %v757_v2, %v331_v21 }
  0x9b   :  { %1140 = vst [vmem:[#allocation9_spill] sm:$0xff] %v882_v42  ;;  %1143 = vst [vmem:[#allocation12_spill] sm:$0xff] %v901_v43  ;;  %v916_v4 = vmul.f32 %v759_v3, %v331_v21  ;;  %v253_v5 = vmul.f32 %v741_v56, %v174_v41  ;;  %v920_v6 = vmul.f32 %v743_v57, %v174_v41 }
  0x9c   :  { %1144 = vst [vmem:[#allocation13_spill] sm:$0xff] %v904_v40  ;;  %1145 = vst [vmem:[#allocation14_spill] sm:$0xff] %v907_v46  ;;  %v923_v11 = vmul.f32 %v745_v58, %v174_v41  ;;  %v926_v7 = vmul.f32 %v747_v59, %v174_v41  ;;  %v257_v12 = vmul.f32 %v749_v60, %v174_v41 }
  0x9d   :  { %1146 = vst [vmem:[#allocation15_spill] sm:$0xff] %v910_v9  ;;  %1147 = vst [vmem:[#allocation16_spill] sm:$0xff] %v913_v10  ;;  %v931_v25 = vmul.f32 %v751_v61, %v882_v42  ;;  %v935_v21 = vmul.f32 %v753_v0, %v882_v42  ;;  %v939_v31 = vmul.f32 %v755_v1, %v882_v42 }
  0x9e   :  { %1148 = vst [vmem:[#allocation17_spill] sm:$0xff] %v916_v4  ;;  %v182_v18 = vpop.permute.xlu1 %181  ;;  %v943_v35 = vmul.f32 %v757_v2, %v882_v42 }
  0x9f   :  { %1149 = vst [vmem:[#allocation18_spill] sm:$0xff] %v931_v25  ;;  %1150 = vst [vmem:[#allocation19_spill] sm:$0xff] %v935_v21  ;;  %v31_v32 = vpop.permute.xlu0 %30  ;;  %v949_v25 = vmul.f32 %v741_v56, %v182_v18  ;;  %v952_v21 = vmul.f32 %v743_v57, %v182_v18  ;;  %v957_v40 = vmul.f32 %v745_v58, %v182_v18 }
  0xa0   :  { %1151 = vst [vmem:[#allocation20_spill] sm:$0xff] %v939_v31  ;;  %1152 = vst [vmem:[#allocation21_spill] sm:$0xff] %v943_v35  ;;  %v116_v36 = vmul.f32 %v731_v51, %v31_v32  ;;  %v117_v41 = vmul.f32 %v733_v52, %v31_v32  ;;  %v118_v4 = vmul.f32 %v735_v53, %v31_v32 }
  0xa1   :  { %1153 = vst [vmem:[#allocation22_spill] sm:$0xff] %v949_v25  ;;  %1154 = vst [vmem:[#allocation23_spill] sm:$0xff] %v952_v21  ;;  %v119_v10 = vmul.f32 %v737_v54, %v31_v32  ;;  %v120_v31 = vmul.f32 %v739_v55, %v31_v32  ;;  %v960_v35 = vmul.f32 %v747_v59, %v182_v18 }
  0xa2   :  { %1155 = vst [vmem:[#allocation24_spill] sm:$0xff] %v957_v40  ;;  %v963_v42 = vmul.f32 %v749_v60, %v182_v18  ;;  %v273_v47 = vadd.f32 %v781_v13, %v116_v36  ;;  %v274_v56 = vadd.f32 %v784_v14, %v117_v41  ;;  %v275_v57 = vadd.f32 %v787_v15, %v118_v4 }
  0xa3   :  { %1156 = vst [vmem:[#allocation25_spill] sm:$0xff] %v960_v35  ;;  %v276_v21 = vadd.f32 %v790_v16, %v119_v10  ;;  %v277_v25 = vadd.f32 %v793_v17, %v120_v31  ;;  %v315_v32 = vpop.permute.xlu1 %314  ;;  %v36_v9 = vpop.permute.xlu0 %35 }
  0xa4   :  { %1157 = vst [vmem:[#allocation26_spill] sm:$0xff] %v963_v42  ;;  %v390_v58 = vmul.f32 %v751_v61, %v315_v32  ;;  %v391_v59 = vmul.f32 %v753_v0, %v315_v32  ;;  %v392_v35 = vmul.f32 %v755_v1, %v315_v32  ;;  %v393_v60 = vmul.f32 %v757_v2, %v315_v32 }
  0xa5   :  { %v394_v13 = vmul.f32 %v759_v3, %v315_v32  ;;  %v121_v14 = vmul.f32 %v731_v51, %v36_v9  ;;  %v122_v15 = vmul.f32 %v733_v52, %v36_v9  ;;  %v123_v16 = vmul.f32 %v735_v53, %v36_v9 }
  0xa6   :  { %v124_v17 = vmul.f32 %v737_v54, %v36_v9  ;;  %v125_v10 = vmul.f32 %v739_v55, %v36_v9  ;;  %v430_v4 = vadd.f32 %v390_v58, %v273_v47  ;;  %v431_v18 = vadd.f32 %v391_v59, %v274_v56 }
  0xa7   :  { %v278_v31 = vadd.f32 %v846_v24, %v121_v14  ;;  %v982_v36 = vadd.f32 %v849_v28, %v122_v15  ;;  %v985_v41 = vadd.f32 %v852_v29, %v123_v16  ;;  %v323_v32 = vpop.permute.xlu1 %322  ;;  %v51_v42 = vpop.permute.xlu0 %50  ;;  %v432_v40 = vadd.f32 %v392_v35, %v275_v57 }
  0xa8   :  { %v988_v46 = vadd.f32 %v857_v30, %v124_v17  ;;  %v991_v43 = vadd.f32 %v863_v33, %v125_v10  ;;  %v994_v47 = vmul.f32 %v751_v61, %v323_v32  ;;  %v997_v24 = vmul.f32 %v753_v0, %v323_v32 }
  0xa9   :  { %v1000_v28 = vmul.f32 %v755_v1, %v323_v32  ;;  %v1003_v29 = vmul.f32 %v757_v2, %v323_v32  ;;  %v1006_v9 = vmul.f32 %v759_v3, %v323_v32  ;;  %v136_v30 = vmul.f32 %v731_v51, %v51_v42 }
  0xaa   :  { %v137_v33 = vmul.f32 %v733_v52, %v51_v42  ;;  %v138_v35 = vmul.f32 %v735_v53, %v51_v42  ;;  %v139_v56 = vmul.f32 %v737_v54, %v51_v42  ;;  %v140_v57 = vmul.f32 %v739_v55, %v51_v42 }
  0xab   :  { %1158 = vst [vmem:[#allocation27_spill] sm:$0xff] %v1003_v29  ;;  %1159 = vst [vmem:[#allocation28_spill] sm:$0xff] %v1006_v9  ;;  %v1013_v58 = vadd.f32 %v253_v5, %v136_v30  ;;  %v327_v59 = vpop.permute.xlu1 %326  ;;  %v61_v14 = vpop.permute.xlu0 %60  ;;  %v433_v15 = vadd.f32 %v393_v60, %v276_v21  ;;  %v434_v16 = vadd.f32 %v394_v13, %v277_v25 }
  0xac   :  { %v1016_v17 = vadd.f32 %v866_v34, %v278_v31  ;;  %v1019_v10 = vadd.f32 %v920_v6, %v137_v33  ;;  %v1022_v32 = vadd.f32 %v923_v11, %v138_v35  ;;  %v1025_v9 = vadd.f32 %v926_v7, %v139_v56 }
  0xad   :  { %v1027_v29 = vadd.f32 %v257_v12, %v140_v57  ;;  %v405_v42 = vmul.f32 %v751_v61, %v327_v59  ;;  %v406_v5 = vmul.f32 %v753_v0, %v327_v59  ;;  %v407_v25 = vmul.f32 %v755_v1, %v327_v59 }
  0xae   :  { %v408_v34 = vmul.f32 %v757_v2, %v327_v59  ;;  %v409_v21 = vmul.f32 %v759_v3, %v327_v59  ;;  %v1035_v6 = vmul.f32 %v731_v51, %v61_v14  ;;  %v1038_v11 = vmul.f32 %v733_v52, %v61_v14 }
  0xaf   :  { %v1041_v7 = vmul.f32 %v735_v53, %v61_v14  ;;  %v1044_v12 = vmul.f32 %v737_v54, %v61_v14  ;;  %v1047_v60 = vmul.f32 %v739_v55, %v61_v14  ;;  %v335_v13 = vpop.permute.xlu1 %334  ;;  %v481_v31 = vpop.permute.xlu0 %480  ;;  %v445_v30 = vadd.f32 %v405_v42, %v801_v26 }
  0xb0   :  { %v446_v33 = vadd.f32 %v406_v5, %v803_v27  ;;  %v415_v51 = vmul.f32 %v751_v61, %v335_v13  ;;  %v416_v52 = vmul.f32 %v753_v0, %v335_v13  ;;  %v417_v35 = vmul.f32 %v755_v1, %v335_v13 }
  0xb1   :  { %1160 = vst [vmem:[#allocation29_spill] sm:$0xff] %v1044_v12  ;;  %1161 = vst [vmem:[#allocation30_spill] sm:$0xff] %v1047_v60  ;;  %v418_v53 = vmul.f32 %v757_v2, %v335_v13  ;;  %v419_v54 = vmul.f32 %v759_v3, %v335_v13  ;;  %v518_v56 = vadd.f32 %v481_v31, %v430_v4 }
  0xb2   :  { %v519_v57 = vadd.f32 %v481_v31, %v431_v18  ;;  %v520_v55 = vadd.f32 %v481_v31, %v432_v40  ;;  %v521_v59 = vadd.f32 %v481_v31, %v433_v15  ;;  %v522_v14 = vadd.f32 %v481_v31, %v434_v16 }
  0xb3   :  { %v447_v60 = vadd.f32 %v407_v25, %v819_v44  ;;  %v448_v26 = vadd.f32 %v408_v34, %v821_v45  ;;  %558 = vst [vmem:[#allocation2] sm:$0xff] %v518_v56  ;;  %v343_v27 = vpop.permute.xlu1 %342  ;;  %v496_v42 = vpop.permute.xlu0 %495  ;;  %v449_v5 = vadd.f32 %v409_v21, %v825_v48  ;;  %v455_v12 = vadd.f32 %v415_v51, %v827_v49  ;;  %v1162_v21 = vld [vmem:[#allocation8_spill] sm:$0xff] }
  0xb4   :  { %559 = vst [vmem:[#allocation2 + $0x8] sm:$0xff] %v519_v57  ;;  %560 = vst [vmem:[#allocation2 + $0x10] sm:$0xff] %v520_v55  ;;  %v456_v13 = vadd.f32 %v416_v52, %v829_v50  ;;  %v457_v4 = vadd.f32 %v417_v35, %v831_v62  ;;  %v425_v40 = vmul.f32 %v751_v61, %v343_v27 }
  0xb5   :  { %561 = vst [vmem:[#allocation2 + $0x18] sm:$0xff] %v521_v59  ;;  %562 = vst [vmem:[#allocation2 + $0x20] sm:$0xff] %v522_v14  ;;  %v426_v44 = vmul.f32 %v753_v0, %v343_v27  ;;  %v427_v45 = vmul.f32 %v755_v1, %v343_v27  ;;  %v428_v18 = vmul.f32 %v757_v2, %v343_v27 }
  0xb6   :  { %v429_v15 = vmul.f32 %v759_v3, %v343_v27  ;;  %v533_v16 = vadd.f32 %v496_v42, %v445_v30  ;;  %v534_v48 = vadd.f32 %v496_v42, %v446_v33  ;;  %v535_v25 = vadd.f32 %v496_v42, %v447_v60  ;;  %v1166_v27 = vld [vmem:[#allocation12_spill] sm:$0xff] }
  0xb7   :  { %v536_v49 = vadd.f32 %v496_v42, %v448_v26  ;;  %v537_v34 = vadd.f32 %v496_v42, %v449_v5  ;;  %v458_v50 = vadd.f32 %v418_v53, %v833_v63  ;;  %v459_v62 = vadd.f32 %v419_v54, %v835_v8  ;;  %v506_v61 = vpop.permute.xlu0 %505  ;;  %v1165_v53 = vld [vmem:[#allocation7_spill] sm:$0xff] }
  0xb8   :  { %573 = vst [vmem:[#allocation2 + $0x78] sm:$0xff] %v533_v16  ;;  %574 = vst [vmem:[#allocation2 + $0x80] sm:$0xff] %v534_v48  ;;  %v436_v0 = vadd.f32 %v871_v37, %v982_v36  ;;  %v437_v1 = vadd.f32 %v874_v38, %v985_v41  ;;  %v438_v2 = vadd.f32 %v877_v39, %v988_v46  ;;  %v486_v33 = vpop.permute.xlu1 %485  ;;  %v1163_v46 = vld [vmem:[#allocation5_spill] sm:$0xff]  ;;  %v1164_v41 = vld [vmem:[#allocation6_spill] sm:$0xff] }
  0xb9   :  { %575 = vst [vmem:[#allocation2 + $0x88] sm:$0xff] %v535_v25  ;;  %v439_v60 = vadd.f32 %v1162_v21, %v991_v43  ;;  %576 = vst [vmem:[#allocation2 + $0x90] sm:$0xff] %v536_v49  ;;  %v543_v63 = vadd.f32 %v506_v61, %v455_v12  ;;  %v544_v8 = vadd.f32 %v506_v61, %v456_v13  ;;  %v1172_v16 = vld [vmem:[#allocation11_spill] sm:$0xff]  ;;  %v1173_v25 = vld [vmem:[#allocation13_spill] sm:$0xff] }
  0xba   :  { %577 = vst [vmem:[#allocation2 + $0x98] sm:$0xff] %v537_v34  ;;  %v545_v31 = vadd.f32 %v506_v61, %v457_v4  ;;  %v546_v30 = vadd.f32 %v506_v61, %v458_v50  ;;  %v547_v51 = vadd.f32 %v506_v61, %v459_v62  ;;  %v523_v52 = vadd.f32 %v486_v33, %v1016_v17  ;;  %v1174_v62 = vld [vmem:[#allocation16_spill] sm:$0xff] }
  0xbb   :  { %v524_v37 = vadd.f32 %v486_v33, %v436_v0  ;;  %v525_v36 = vadd.f32 %v486_v33, %v437_v1  ;;  %583 = vst [vmem:[#allocation2 + $0xc8] sm:$0xff] %v543_v63  ;;  %584 = vst [vmem:[#allocation2 + $0xd0] sm:$0xff] %v544_v8  ;;  %v526_v38 = vadd.f32 %v486_v33, %v438_v2  ;;  %v516_v12 = vpop.permute.xlu0 %515  ;;  %v1175_v0 = vld [vmem:[#allocation17_spill] sm:$0xff]  ;;  %v1176_v2 = vld [vmem:[#allocation22_spill] sm:$0xff] }
  0xbc   :  { %585 = vst [vmem:[#allocation2 + $0xd8] sm:$0xff] %v545_v31  ;;  %586 = vst [vmem:[#allocation2 + $0xe0] sm:$0xff] %v546_v30  ;;  %v527_v39 = vadd.f32 %v486_v33, %v439_v60  ;;  %v465_v43 = vadd.f32 %v425_v40, %v1163_v46  ;;  %v466_v35 = vadd.f32 %v426_v44, %v1164_v41  ;;  %v491_v14 = vpop.permute.xlu1 %490  ;;  %v1168_v40 = vld [vmem:[#allocation27_spill] sm:$0xff]  ;;  %v1178_v30 = vld [vmem:[#allocation24_spill] sm:$0xff] }
  0xbd   :  { %587 = vst [vmem:[#allocation2 + $0xe8] sm:$0xff] %v547_v51  ;;  %563 = vst [vmem:[#allocation2 + $0x28] sm:$0xff] %v523_v52  ;;  %v467_v54 = vadd.f32 %v427_v45, %v1165_v53  ;;  %v468_v17 = vadd.f32 %v428_v18, %v890_v19  ;;  %v469_v56 = vadd.f32 %v429_v15, %v892_v20  ;;  %v1167_v19 = vld [vmem:[#allocation14_spill] sm:$0xff]  ;;  %v1180_v51 = vld [vmem:[#allocation25_spill] sm:$0xff] }
  0xbe   :  { %564 = vst [vmem:[#allocation2 + $0x30] sm:$0xff] %v524_v37  ;;  %565 = vst [vmem:[#allocation2 + $0x38] sm:$0xff] %v525_v36  ;;  %v440_v57 = vadd.f32 %v994_v47, %v895_v23  ;;  %v553_v55 = vadd.f32 %v516_v12, %v465_v43  ;;  %v554_v59 = vadd.f32 %v516_v12, %v466_v35  ;;  %v1169_v23 = vld [vmem:[#allocation15_spill] sm:$0xff]  ;;  %v1170_v47 = vld [vmem:[#allocation28_spill] sm:$0xff] }
  0xbf   :  { %566 = vst [vmem:[#allocation2 + $0x40] sm:$0xff] %v526_v38  ;;  %567 = vst [vmem:[#allocation2 + $0x48] sm:$0xff] %v527_v39  ;;  %v441_v26 = vadd.f32 %v997_v24, %v898_v22  ;;  %v442_v42 = vadd.f32 %v1000_v28, %v1166_v27  ;;  %v555_v5 = vadd.f32 %v516_v12, %v467_v54  ;;  %v1171_v24 = vld [vmem:[#allocation10_spill] sm:$0xff]  ;;  %v1185_v46 = vld [vmem:[#allocation19_spill] sm:$0xff] }
  0xc0   :  { %v556_v13 = vadd.f32 %v516_v12, %v468_v17  ;;  %v557_v4 = vadd.f32 %v516_v12, %v469_v56  ;;  %v443_v20 = vadd.f32 %v1168_v40, %v1167_v19  ;;  %593 = vst [vmem:[#allocation2 + $0x118] sm:$0xff] %v553_v55  ;;  %594 = vst [vmem:[#allocation2 + $0x120] sm:$0xff] %v554_v59  ;;  %v501_v50 = vpop.permute.xlu1 %500  ;;  %v1183_v36 = vld [vmem:[#allocation26_spill] sm:$0xff]  ;;  %v1187_v12 = vld [vmem:[#allocation21_spill] sm:$0xff] }
  0xc1   :  { %v444_v44 = vadd.f32 %v1170_v47, %v1169_v23  ;;  %v528_v45 = vadd.f32 %v491_v14, %v440_v57  ;;  %v529_v18 = vadd.f32 %v491_v14, %v441_v26  ;;  %v530_v15 = vadd.f32 %v491_v14, %v442_v42  ;;  %595 = vst [vmem:[#allocation2 + $0x128] sm:$0xff] %v555_v5  ;;  %v1184_v39 = vld [vmem:[#allocation18_spill] sm:$0xff] }
  0xc2   :  { %596 = vst [vmem:[#allocation2 + $0x130] sm:$0xff] %v556_v13  ;;  %597 = vst [vmem:[#allocation2 + $0x138] sm:$0xff] %v557_v4  ;;  %v531_v22 = vadd.f32 %v491_v14, %v443_v20  ;;  %v450_v28 = vadd.f32 %v1171_v24, %v1013_v58  ;;  %v451_v48 = vadd.f32 %v1172_v16, %v1019_v10 }
  0xc3   :  { %v452_v49 = vadd.f32 %v1173_v25, %v1022_v32  ;;  %v532_v34 = vadd.f32 %v491_v14, %v444_v44  ;;  %568 = vst [vmem:[#allocation2 + $0x50] sm:$0xff] %v528_v45  ;;  %569 = vst [vmem:[#allocation2 + $0x58] sm:$0xff] %v529_v18  ;;  %v453_v61 = vadd.f32 %v1174_v62, %v1025_v9  ;;  %v1177_v32 = vld [vmem:[#allocation23_spill] sm:$0xff]  ;;  %v1179_v9 = vld [vmem:[#allocation29_spill] sm:$0xff] }
  0xc4   :  { %570 = vst [vmem:[#allocation2 + $0x60] sm:$0xff] %v530_v15  ;;  %v454_v1 = vadd.f32 %v1175_v0, %v1027_v29  ;;  %v303_v58 = vadd.f32 %v1176_v2, %v1035_v6  ;;  %571 = vst [vmem:[#allocation2 + $0x68] sm:$0xff] %v531_v22  ;;  %v538_v21 = vadd.f32 %v501_v50, %v450_v28  ;;  %v1181_v29 = vld [vmem:[#allocation9_spill] sm:$0xff]  ;;  %v1182_v6 = vld [vmem:[#allocation30_spill] sm:$0xff]  ;;  %v511_v41 = vpop.permute.xlu1 %510 }
  0xc5   :  { %v539_v10 = vadd.f32 %v501_v50, %v451_v48  ;;  %v540_v60 = vadd.f32 %v501_v50, %v452_v49  ;;  %v304_v63 = vadd.f32 %v1177_v32, %v1038_v11  ;;  %572 = vst [vmem:[#allocation2 + $0x70] sm:$0xff] %v532_v34  ;;  %v541_v8 = vadd.f32 %v501_v50, %v453_v61 }
  0xc6   :  { %v542_v31 = vadd.f32 %v501_v50, %v454_v1  ;;  %v305_v33 = vadd.f32 %v1178_v30, %v1041_v7  ;;  %v306_v52 = vadd.f32 %v1180_v51, %v1179_v9  ;;  %v424_v37 = vmul.f32 %v759_v3, %v1181_v29  ;;  %578 = vst [vmem:[#allocation2 + $0xa0] sm:$0xff] %v538_v21  ;;  %v1186_v7 = vld [vmem:[#allocation20_spill] sm:$0xff] }
  0xc7   :  { %579 = vst [vmem:[#allocation2 + $0xa8] sm:$0xff] %v539_v10  ;;  %580 = vst [vmem:[#allocation2 + $0xb0] sm:$0xff] %v540_v60  ;;  %v307_v38 = vadd.f32 %v1183_v36, %v1182_v6  ;;  %v460_v11 = vadd.f32 %v1184_v39, %v303_v58  ;;  %v461_v43 = vadd.f32 %v1185_v46, %v304_v63 }
  0xc8   :  { %581 = vst [vmem:[#allocation2 + $0xb8] sm:$0xff] %v541_v8  ;;  %582 = vst [vmem:[#allocation2 + $0xc0] sm:$0xff] %v542_v31  ;;  %v462_v35 = vadd.f32 %v1186_v7, %v305_v33  ;;  %v463_v53 = vadd.f32 %v1187_v12, %v306_v52 }
  0xc9   :  { %v464_v3 = vadd.f32 %v424_v37, %v307_v38  ;;  %v548_v54 = vadd.f32 %v511_v41, %v460_v11  ;;  %v549_v17 = vadd.f32 %v511_v41, %v461_v43 }
  0xca   :  { %v550_v56 = vadd.f32 %v511_v41, %v462_v35  ;;  %v551_v57 = vadd.f32 %v511_v41, %v463_v53 }
  0xcb   :  { %v552_v55 = vadd.f32 %v511_v41, %v464_v3  ;;  %588 = vst [vmem:[#allocation2 + $0xf0] sm:$0xff] %v548_v54  ;;  %589 = vst [vmem:[#allocation2 + $0xf8] sm:$0xff] %v549_v17 }
  0xcc   :  { %590 = vst [vmem:[#allocation2 + $0x100] sm:$0xff] %v550_v56  ;;  %591 = vst [vmem:[#allocation2 + $0x108] sm:$0xff] %v551_v57 }
  0xcd   :  { %592 = vst [vmem:[#allocation2 + $0x110] sm:$0xff] %v552_v55 }
  0xce   :  { %638 = shalt.err (!%p635_p4)
}
  0xcf   :  { %s639_s23 = scalar_lea.hbm %s1134_s3, 5120 }
  0xd0   :  { %p640_p5 = scmp.ne.s32.totalorder %s1134_s3, %s639_s23  ;;  %p643_p6 = scmp.lt.u32.totalorder %s639_s23, %s1134_s3 }
  0xd2   :  { %p645_p7 = pnand %p643_p6, %p640_p5 }
  0xd4   :  { %648 = shalt.err (!%p645_p7)
}
  0xd5   :  { %s655_s28 = smov 640   ;;  %s656_s29 = smov 40  }
  0xd6   :  { %609 = dma.vmem_to_hbm [thread:$0]  %s604_s2, 5120, %s1134_s3, [#allocation3], %s655_s28, %s655_s28, %s656_s29  }
  0xd7   :  { %649 = dma.done.wait [#allocation3], 5120  }
  0xd8   :  { %650 = vsyncadd [#allocation3], 4294962176 }
  0xd9   :  { %613 = vsyncpa [#allocation3], 1 }

</bundles_post_ra>
